<compile_context>
chip_gen: v5e
topology: v5e:2x2
jax: 0.10.0
libtpu: 0.0.40
codegen_flags: <defaults>
</compile_context>

<pallas_src>
import jax
import jax.numpy as jnp
from jax.experimental import pallas as pl
from jax.experimental.pallas import tpu as pltpu


def _pick_tile(dim, candidates=(512, 256, 128)):
    """Largest lane-aligned tile that evenly divides `dim`; else the full dim."""
    for t in candidates:
        if dim % t == 0:
            return t
    return dim


def _make_qk_kernel(scale_sq):
    def _qk_kernel(q_ref, k_ref, o_ref):
        # q_ref: (1, C, tT), k_ref: (1, C, tS), o_ref: (1, tT, tS)
        # Contract over the channel axis C (axis 0 of both per-batch tiles) on
        # the MXU: q^T @ k -> (tT, tS), accumulated in f32.
        acc = jax.lax.dot_general(
            q_ref[0], k_ref[0],
            dimension_numbers=(((0,), (0,)), ((), ())),
            preferred_element_type=jnp.float32,
        )
        # Fold (q*s)^T (k*s) == s^2 * (q^T k) into one f32 multiply of the
        # accumulator (compile-time immediate, numerically close to the ref).
        o_ref[0] = (acc * scale_sq).astype(o_ref.dtype)

    return _qk_kernel


def quant_qk_matmul(q, k, scale):
    """weight = einsum('bct,bcs->bts', q * scale, k * scale)."""
    B, C, T = q.shape
    Bk, Ck, S = k.shape
    assert B == Bk and C == Ck

    tT = _pick_tile(T)
    tS = _pick_tile(S)

    scale_sq = float(scale) * float(scale)
    kernel = _make_qk_kernel(scale_sq)

    # Explicit scoped-VMEM request: double-buffered q/k/out tiles plus margin,
    # clamped to fit every generation (v7x physical VMEM is 64 MiB / TC).
    itemsize = jnp.dtype(q.dtype).itemsize
    tile_bytes = (C * tT + C * tS + tT * tS) * itemsize
    vmem_bytes = int(min(max(2 * tile_bytes + (2 << 20), 4 << 20), 64 << 20))

    grid = (B, T // tT, S // tS)

    grid_spec = pltpu.PrefetchScalarGridSpec(
        num_scalar_prefetch=0,
        grid=grid,
        in_specs=[
            # q tile depends only on (b, i): stays resident across the inner
            # S-tile axis, so it is not re-fetched per j step.
            # NOTE: if profiling still shows exposed DMA at small C, add
            # pipeline_mode=pl.Buffered(3) to the k spec.
            pl.BlockSpec((1, C, tT), lambda b, i, j: (b, 0, i)),
            pl.BlockSpec((1, C, tS), lambda b, i, j: (b, 0, j)),
        ],
        out_specs=pl.BlockSpec((1, tT, tS), lambda b, i, j: (b, i, j)),
    )

    return pl.pallas_call(
        kernel,
        out_shape=jax.ShapeDtypeStruct((B, T, S), q.dtype),
        grid_spec=grid_spec,
        compiler_params=pltpu.CompilerParams(
            dimension_semantics=("parallel", "parallel", "parallel"),
            vmem_limit_bytes=vmem_bytes,
        ),
    )(q, k)


def _reference(q, k, scale):
    return jnp.einsum('bct,bcs->bts', q * scale, k * scale)


if __name__ == "__main__":
    key = jax.random.PRNGKey(0)
    kq, kk = jax.random.split(key)

    # Small shapes consistent with the module, chosen so the tiled grid is
    # exercised: tT = tS = 128 -> grid = (2, 3, 3) with q reused across j.
    B, C, T, S = 2, 32, 384, 384
    q = jax.random.normal(kq, (B, C, T), dtype=jnp.float32)
    k = jax.random.normal(kk, (B, C, S), dtype=jnp.float32)
    # In diffusion attention blocks, self.scale is set to 1/sqrt(C) externally.
    scale = float(1.0 / (C ** 0.5))

    out = quant_qk_matmul(q, k, scale)
    out = jax.block_until_ready(out)

    ref = _reference(q, k, scale)
    assert out.shape == (B, T, S)
    assert jnp.allclose(out, ref, atol=2e-4, rtol=2e-4), "mismatch vs reference"

    print("KERNEL_OK")
</pallas_src>

<mosaic_0001>
module attributes {stable_mosaic.version = 11 : i64} {
  func.func @_qk_kernel(%arg0: i32, %arg1: i32, %arg2: i32, %arg3: memref<1x32x128xf32, #tpu.memory_space<vmem>>, %arg4: memref<1x32x128xf32, #tpu.memory_space<vmem>>, %arg5: memref<1x128x128xf32, #tpu.memory_space<vmem>>) attributes {dimension_semantics = [#tpu.dimension_semantics<parallel>, #tpu.dimension_semantics<parallel>, #tpu.dimension_semantics<parallel>], iteration_bounds = array<i64: 2, 3, 3>, scalar_prefetch = 0 : i64, scratch_operands = 0 : i64, tpu.core_type = #tpu.core_type<tc>, window_params = [{transform_indices = @transform_0, window_bounds = array<i64: 1, 32, 128>}, {transform_indices = @transform_1, window_bounds = array<i64: 1, 32, 128>}, {transform_indices = @transform_2, window_bounds = array<i64: 1, 128, 128>}]} {
    %c0 = arith.constant 0 : index
    %c0_0 = arith.constant 0 : index
    %c0_1 = arith.constant 0 : index
    %0 = vector.load %arg3[%c0, %c0_0, %c0_1] : memref<1x32x128xf32, #tpu.memory_space<vmem>>, vector<1x32x128xf32>
    %1 = vector.shape_cast %0 : vector<1x32x128xf32> to vector<32x128xf32>
    %c0_2 = arith.constant 0 : index
    %c0_3 = arith.constant 0 : index
    %c0_4 = arith.constant 0 : index
    %2 = vector.load %arg4[%c0_2, %c0_3, %c0_4] : memref<1x32x128xf32, #tpu.memory_space<vmem>>, vector<1x32x128xf32>
    %3 = vector.shape_cast %2 : vector<1x32x128xf32> to vector<32x128xf32>
    %cst = arith.constant dense<0.000000e+00> : vector<128x128xf32>
    %4 = tpu.matmul %1, %3, %cst {dimension_numbers = #tpu.dot_dimension_numbers<[0], [0], [1], [1], [0, 1, 1, 1], [], []>} : vector<32x128xf32>, vector<32x128xf32>, vector<128x128xf32> -> vector<128x128xf32>
    %cst_5 = arith.constant 3.125000e-02 : f32
    %5 = vector.broadcast %cst_5 : f32 to vector<128x128xf32>
    %6 = arith.mulf %4, %5 : vector<128x128xf32>
    %c0_6 = arith.constant 0 : index
    %c0_7 = arith.constant 0 : index
    %c0_8 = arith.constant 0 : index
    %7 = vector.load %arg5[%c0_6, %c0_7, %c0_8] : memref<1x128x128xf32, #tpu.memory_space<vmem>>, vector<1x128x128xf32>
    %8 = vector.shape_cast %7 : vector<1x128x128xf32> to vector<128x128xf32>
    %9 = vector.shape_cast %6 : vector<128x128xf32> to vector<1x128x128xf32>
    tpu.vector_store %arg5[%c0_6, %c0_7, %c0_8], %9 {strides = array<i32>} : memref<1x128x128xf32, #tpu.memory_space<vmem>>, vector<1x128x128xf32>,
    return
  }
  func.func @transform_0(%arg0: i32, %arg1: i32, %arg2: i32) -> (i32, i32, i32) {
    %c0_i32 = arith.constant 0 : i32
    %c0_i32_0 = arith.constant 0 : i32
    return %arg0, %c0_i32, %arg1 : i32, i32, i32
  }
  func.func @transform_1(%arg0: i32, %arg1: i32, %arg2: i32) -> (i32, i32, i32) {
    %c0_i32 = arith.constant 0 : i32
    %c0_i32_0 = arith.constant 0 : i32
    return %arg0, %c0_i32, %arg2 : i32, i32, i32
  }
  func.func @transform_2(%arg0: i32, %arg1: i32, %arg2: i32) -> (i32, i32, i32) {
    %c0_i32 = arith.constant 0 : i32
    return %arg0, %arg1, %arg2 : i32, i32, i32
  }
}

</mosaic_0001>

<bundles_post_ra>
// kernel: tpu_custom_call.1
= control target key start
LH: loop header
LB: loop body
LE: loop exit
PB: predicated region body
PF: predicated region fallthrough
CT: control target
= control target key end

     0   :  { %s1351_s0 = inlined_call_operand.hbm [shape: f32[2,32,384], index: 0, kind: input, shape index: {}]   ;;  %s1352_s1 = inlined_call_operand.hbm [shape: f32[2,32,384], index: 1, kind: input, shape index: {}]   ;;  %s1353_s2 = inlined_call_operand.hbm [shape: f32[2,384,384], index: 2, kind: output, shape index: {}]  }
   0x1   :  { %1371 = sst [smem:[#allocation24_spill]] %s1351_s0 }
   0x2   :  { %1372 = sst [smem:[#allocation25_spill]] %s1353_s2 }
   0x3   :  { %7 = vsyncpa [#allocation3], 0 }
   0x4   :  { %9 = vsyncpa [#allocation3 + $0x1], 0 }
   0x5   :  { %10 = vsyncpa [#allocation6], 0 }
   0x6   :  { %12 = vsyncpa [#allocation6 + $0x1], 0 }
   0x7   :  { %13 = vsyncpa [#allocation4], 0 }
   0x8   :  { %15 = vsyncpa [#allocation4 + $0x1], 0  ;;  %s1016_s9 = smov 0   ;;  %s1018_s10 = smov 0  }
   0x9   :  { %s1020_s11 = smov 0   ;;  %s1022_s12 = smov 0  }
   0xa   :  { %s1024_s13 = smov 0   ;;  %s1026_s14 = smov 0  }
   0xb   :  { %s1028_s15 = smov 0   ;;  %s1030_s16 = smov 0  }
   0xc   :  { %s1032_s17 = smov 0   ;;  %s1034_s18 = smov 0  }
   0xd   :  { %s1036_s19 = smov 0   ;;  %s1038_s20 = smov 0  }
   0xe   :  { %s1040_s21 = smov 0   ;;  %s1042_s22 = smov 0  }
   0xf   :  { %s1044_s23 = smov 0   ;;  %s1046_s24 = smov 0  }
  0x10 LB: > { %1373 = sst [smem:[#allocation11_spill]] %s933_s9  ;;  %s563_s25 = sadd.s32 4294967295, %s993_s24   ;;  %s993_s24 = sphi %s1046_s24, %s21_s24   ;;  %s989_s23 = sphi %s1044_s23, %s1435_s23   ;;  %s985_s22 = sphi %s1042_s22, %s1421_s22   ;;  %s981_s21 = sphi %s1040_s21, %s1420_s21   ;;  %s977_s20 = sphi %s1038_s20, %s1434_s20   ;;  %s973_s19 = sphi %s1036_s19, %s1418_s19   ;;  %s969_s18 = sphi %s1034_s18, %s1433_s18   ;;  %s965_s17 = sphi %s1032_s17, %s1432_s17   ;;  %s961_s16 = sphi %s1030_s16, %s1431_s16   ;;  %s957_s15 = sphi %s1028_s15, %s1430_s15   ;;  %s953_s14 = sphi %s1026_s14, %s1429_s14   ;;  %s949_s13 = sphi %s1024_s13, %s1428_s13   ;;  %s945_s12 = sphi %s1022_s12, %s1427_s12   ;;  %s941_s11 = sphi %s1020_s11, %s1426_s11   ;;  %s937_s10 = sphi %s1018_s10, %s1425_s10   ;;  %s933_s9 = sphi %s1016_s9, %s1423_s9  }
  0x11   : > { %1374 = sst [smem:[#allocation12_spill]] %s937_s10  ;;  %p56_p0 = scmp.ne.s32.totalorder %s965_s17, %s961_s16 }
  0x12   : > { %1375 = sst [smem:[#allocation13_spill]] %s969_s18  ;;  %p57_p1 = scmp.eq.s32.totalorder %s993_s24, 0 }
  0x13   : > { %1376 = sst [smem:[#allocation14_spill]] %s973_s19  ;;  %p62_p2 = scmp.ne.s32.totalorder %s961_s16, %s957_s15 }
  0x14   : > { %1377 = sst [smem:[#allocation15_spill]] %s977_s20  ;;  %p1102_p3 = scmp.eq.s32.totalorder %s563_s25, 0 }
  0x15   : > { %1378 = sst [smem:[#allocation16_spill]] %s981_s21  ;;  %p58_p4 = por %p57_p1, %p56_p0 }
  0x16   : > { %1379 = sst [smem:[#allocation17_spill]] %s985_s22  ;;  %p1108_p5 = scmp.eq.s32.totalorder %s563_s25, 17 }
  0x17   : > { %1380 = sst [smem:[#allocation18_spill]] %s989_s23  ;;  %p1114_p6 = por %p1102_p3, %p62_p2 }
  0x18   : > { %p630_p7 = scmp.lt.s32.totalorder %s993_s24, 18  ;;  %s144_s4 = sand.u32 1, %s965_s17  }
  0x19   : > { %s567_s5 = sshll.u32 %s144_s4, 5  ;;  %s1355_s6 = smul.u32 12, %s989_s23 }
  0x1a   : > { %s148_s7 = scalar_lea.vmem [#allocation2], %s567_s5  ;;  %p620_p8 = pnand %p630_p7, %p58_p4 }
  0x1b   : > { %s157_s8 = sshll.u32 %s148_s7, 4  ;;  %s152_s15 = sadd.s32 %s985_s22, %s1355_s6  ;;  %s158_s8 = int_to_ptr.vmem [resolvable:$true] %s157_s8 }
  0x1c   : > { %s568_s25 = sshll.u32 %s152_s15, 3  ;;  %s1384_s0 = sld [smem:[#allocation24_spill]] }
  0x1d   : > { %s145_s5 = scalar_lea.sflag [#allocation3], %s144_s4  ;;  %s1356_s7 = smov 384  }
  0x1e   : > { %s1357_s6 = smov 128   ;;  %s1358_s18 = smov 8  }
  0x1f   : > { %p571_p9 = scmp.ge.s32.totalorder %s993_s24, 1  ;;  %p188_p10 = scmp.lt.s32.totalorder %s993_s24, 19 }
  0x20   : > { %s564_s27 = sadd.s32 4294967294, %s993_s24   ;;  %s33_s28 = sadd.s32 1, %s981_s21 }
  0x21   : > { %p1134_p11 = pnand %p571_p9, %p188_p10  ;;  %p34_p12 = scmp.ge.s32.totalorder %s33_s28, 3 }
  0x22   : > { %s154_s26 = scalar_lea.hbm %s1384_s0, %s568_s25  ;;  %p84_p13 = scmp.ne.s32.totalorder %s953_s14, %s949_s13 }
  0x23   : > { %s155_s2 = sshll.u32 %s154_s26, 4  ;;  %p90_p0 = scmp.ne.s32.totalorder %s949_s13, %s945_s12  ;;  %s156_s2 = int_to_ptr.hbm [resolvable:$true] %s155_s2 }
  0x24   : > { %622 = dma.hbm_to_vmem [thread:$0]  (!%p620_p8), %s156_s2, 512, %s158_s8, %s145_s5, %s1356_s7, %s1357_s6, %s1358_s18  }
  0x25   : > { %s1437_s28 = smov (%p34_p12, %s33_s28), 0  ;;  %s1387_s8 = sadd.s32 1, %s985_s22 }
  0x26   : > { %1386 = sst [smem:[#allocation19_spill]] %s1437_s28  ;;  %s1439_s8 = smov (!%p34_p12, %s1387_s8), %s985_s22 }
  0x27   : > { %s73_s15 = ssub.s32 %s981_s21, %s1437_s28  ;;  %p1155_p2 = por %p84_p13, %p57_p1 }
  0x28   : > { %p38_p4 = scmp.ge.s32.totalorder %s1439_s8, 3  ;;  %p1161_p8 = por %p90_p0, %p1102_p3 }
  0x29   : > { %p117_p9 = scmp.ne.s32.totalorder %s941_s11, %s937_s10  ;;  %p123_p10 = scmp.ne.s32.totalorder %s937_s10, %s933_s9 }
  0x2a   : > { %s1441_s8 = smov (%p38_p4, %s1439_s8), 0  ;;  %s1391_s5 = sadd.s32 1, %s989_s23 }
  0x2b   : > { %1390 = sst [smem:[#allocation20_spill]] %s1441_s8  ;;  %s1443_s5 = smov (!%p38_p4, %s1391_s5), %s989_s23 }
  0x2c   : > { %s45_s7 = ssub.s32 %s985_s22, %s1441_s8  ;;  %p1178_p1 = por %p1108_p5, %p117_p9 }
  0x2d   : > { %p42_p3 = scmp.ge.s32.totalorder %s1443_s5, 2  ;;  %p124_p12 = scmp.eq.s32.totalorder %s564_s27, 17 }
  0x2e   : > { %s1392_s6 = scalar_select %p1178_p1, 1, 0 }
  0x2f   : > { %s167_s29 = sand.u32 1, %s953_s14   ;;  %s1394_s18 = smul.u32 12, %s989_s23 }
  0x30   : > { %1393 = sst [smem:[#allocation21_spill]] %s1392_s6  ;;  %s1445_s5 = smov (%p42_p3, %s1443_s5), 0 }
  0x31   : > { %s175_s2 = sadd.s32 %s981_s21, %s1394_s18  ;;  %1395 = sst [smem:[#allocation22_spill]] %s1445_s5 }
  0x32   : > { %p1188_p13 = por %p124_p12, %p123_p10  ;;  %s44_s30 = ssub.s32 %s989_s23, %s1445_s5 }
  0x33   : > { %s569_s0 = sshll.u32 %s167_s29, 5  ;;  %s46_s8 = sor.u32 %s45_s7, %s44_s30 }
  0x34   : > { %s1396_s4 = scalar_select %p1188_p13, 1, 0 }
  0x35   : > { %s74_s28 = sor.u32 %s73_s15, %s44_s30  ;;  %p47_p5 = scmp.eq.s32.totalorder %s46_s8, 0 }
  0x36   : > { %1397 = sst [smem:[#allocation23_spill]] %s1396_s4  ;;  %p75_p0 = scmp.eq.s32.totalorder %s74_s28, 0 }
  0x37   : > { %s104_s27 = sor.u32 %s73_s15, %s46_s8  ;;  %s1398_s22 = sadd.s32 1, %s965_s17 }
  0x38   : > { %s1197_s18 = scalar_select %p47_p5, %s965_s17, %s1398_s22  }
  0x39   : > { %s1399_s21 = sadd.s32 1, %s953_s14  ;;  %p105_p4 = scmp.eq.s32.totalorder %s104_s27, 0 }
  0x3a   : > { %s1202_s9 = scalar_select %p75_p0, %s953_s14, %s1399_s21  }
  0x3b   : > { %s570_s6 = sshll.u32 %s175_s2, 3  ;;  %s171_s23 = scalar_lea.vmem [#allocation5], %s569_s0 }
  0x3c   : > { %s177_s5 = scalar_lea.hbm %s1352_s1, %s570_s6  ;;  %s180_s7 = sshll.u32 %s171_s23, 4  ;;  %s181_s7 = int_to_ptr.vmem [resolvable:$true] %s180_s7 }
  0x3d   : > { %s1400_s4 = sadd.s32 1, %s941_s11  ;;  %s178_s30 = sshll.u32 %s177_s5, 4  ;;  %s179_s30 = int_to_ptr.hbm [resolvable:$true] %s178_s30 }
  0x3e   : > { %s1210_s10 = scalar_select %p105_p4, %s941_s11, %s1400_s4  }
  0x3f   : > { %p623_p9 = pnand %p630_p7, %p1155_p2  ;;  %s168_s22 = scalar_lea.sflag [#allocation6], %s167_s29 }
  0x40   : > { %s1401_s21 = smov 8   ;;  %s1402_s28 = smov 128  }
  0x41   : > { %s1403_s8 = smov 384   ;;  %192 = sbr.rel (%p1134_p11) target bundleno = 500 (0x1f4), region = 28 }
  0x42   : > { %625 = dma.hbm_to_vmem [thread:$0]  (!%p623_p9), %s179_s30, 512, %s181_s7, %s168_s22, %s1403_s8, %s1402_s28, %s1401_s21  }
  0x43   : > { %s194_s0 = sand.u32 (!%p1134_p11), 1, %s961_s16  }
  0x44   : > { %s572_s19 = sshll.u32 (!%p1134_p11), %s194_s0, 5  ;;  %s195_s20 = scalar_lea.sflag (!%p1134_p11), [#allocation3], %s194_s0 }
  0x45   : > { %s1222_s23 = scalar_lea.vmem (!%p1134_p11), [#allocation2], %s572_s19 }
  0x46   : > { %920 = dma.done.wait (%p1114_p6), %s195_s20, 512  }
  0x47   : > { %922 = vsyncadd (%p1114_p6), %s195_s20, 4294966784  ;;  %s204_s6 = sand.u32 1, %s949_s13  }
  0x48   : > { %s573_s4 = sshll.u32 %s204_s6, 5  ;;  %s205_s2 = scalar_lea.sflag [#allocation6], %s204_s6 }
  0x49   : > { %s208_s15 = scalar_lea.vmem [#allocation5], %s573_s4 }
  0x4a   : > { %924 = dma.done.wait (%p1161_p8), %s205_s2, 512  }
  0x4b   : > { %926 = vsyncadd (%p1161_p8), %s205_s2, 4294966784  ;;  %v236_v0 = vld [vmem:[%s1222_s23] sm:$0xff]  ;;  %v243_v1 = vld [vmem:[%s208_s15 + $0x18] sm:$0xff]  ;;  %vm276_vm0 = vcmask 261120   ;;  %s1404_s3 = sld [smem:[#allocation12_spill]] }
  0x4c   : > { %244 = vxpose.xlu0.b32.start [1/4] (short) %v236_v0, 128  ;;  %v242_v2 = vld [vmem:[%s208_s15 + $0x10] sm:$0xff]  ;;  %337 = vmatpush.msra.mxu0 %v243_v1  ;;  %v241_v3 = vld [vmem:[%s208_s15 + $0x8] sm:$0xff]  ;;  %v240_v4 = vld [vmem:[%s208_s15] sm:$0xff]  ;;  %s1405_s5 = sld [smem:[#allocation14_spill]] }
  0x4d   : > { %597 = vmatpush.msra.mxu1 %v243_v1  ;;  %598 = vmatpush.msra.mxu2 %v243_v1  ;;  %v237_v5 = vld [vmem:[%s1222_s23 + $0x8] sm:$0xff]  ;;  %v238_v6 = vld [vmem:[%s1222_s23 + $0x10] sm:$0xff]  ;;  %v239_v7 = vld [vmem:[%s1222_s23 + $0x18] sm:$0xff]  ;;  %s1406_s29 = sld [smem:[#allocation15_spill]] }
  0x4e   : > { %599 = vmatpush.msra.mxu3 %v243_v1  ;;  %338 = vmatpush.msra.mxu0 %v242_v2  ;;  %s1407_s27 = sld [smem:[#allocation13_spill]] }
  0x4f   : > { %600 = vmatpush.msra.mxu1 %v242_v2  ;;  %601 = vmatpush.msra.mxu2 %v242_v2  ;;  %s1409_s20 = sld [smem:[#allocation25_spill]] }
  0x50   : > { %602 = vmatpush.msra.mxu3 %v242_v2  ;;  %339 = vmatpush.msra.mxu0 %v241_v3 }
  0x51   : > { %603 = vmatpush.msra.mxu1 %v241_v3  ;;  %604 = vmatpush.msra.mxu2 %v241_v3  ;;  %s232_s26 = sand.u32 1, %s1404_s3  }
  0x52   : > { %605 = vmatpush.msra.mxu3 %v241_v3  ;;  %340 = vmatpush.msra.mxu0 %v240_v4  ;;  %s574_s25 = sshll.u32 %s232_s26, 7  ;;  %s611_s7 = smul.u32 48, %s1405_s5 }
  0x53   : > { %606 = vmatpush.msra.mxu1 %v240_v4  ;;  %607 = vmatpush.msra.mxu2 %v240_v4  ;;  %s1256_s12 = scalar_lea.vmem [#allocation7], %s574_s25  ;;  %s612_s30 = smul.u32 144, %s1406_s29 }
  0x54   : > { %245 = vxpose.xlu0.b32.cont [2/4] (short) %v237_v5, 128  ;;  %608 = vmatpush.msra.mxu3 %v240_v4  ;;  %s434_s22 = sadd.s32 %s1407_s27, %s611_s7  ;;  %s439_s4 = sshll.u32 %s1256_s12, 4  ;;  %s440_s4 = int_to_ptr.vmem [resolvable:$true] %s439_s4 }
  0x55   : > { %s436_s21 = sadd.s32 %s612_s30, %s434_s22  ;;  %s1410_s6 = smov %s1409_s20 }
  0x56   : > { %s594_s28 = sshll.u32 %s436_s21, 3  ;;  %s423_s15 = scalar_lea.sflag [#allocation4], %s232_s26 }
  0x57   : > { %s438_s23 = scalar_lea.hbm %s1409_s20, %s594_s28  ;;  %s847_s7 = scalar_lea.hbm %s1410_s6, 2304 }
  0x58   : > { %s441_s2 = sshll.u32 %s438_s23, 4  ;;  %s442_s2 = int_to_ptr.hbm [resolvable:$true] %s441_s2 }
  0x59   : > { %s841_s25 = sshra.s32 %s442_s2, 4  ;;  %s842_s25 = int_to_ptr.hbm [resolvable:$true] %s841_s25 }
  0x5a   : > { %s843_s5 = scalar_lea.hbm %s842_s25, 128  ;;  %p848_p2 = scmp.lt.s32.totalorder %s842_s25, %s1410_s6 }
  0x5b   : > { %p844_p6 = scmp.ne.s32.totalorder %s842_s25, %s843_s5  ;;  %p849_p8 = scmp.lt.s32.totalorder %s847_s7, %s843_s5 }
  0x5c   : > { %246 = vxpose.xlu0.b32.cont [3/4] (short) %v238_v6, 128 }
  0x5d   : > { %p845_p7 = pnand %p844_p6, %p1178_p1  ;;  %p850_p10 = por %p849_p8, %p848_p2 }
  0x5f   : > { %p846_p11 = pneg %p845_p7 }
  0x61   : > { %p851_p3 = pnand %p850_p10, %p846_p11 }
  0x64   : > { %247 = vxpose.xlu0.b32.end [4/4] (short) %v239_v7, 128 }
  0xf0   : > { %v260_v8 = vpop.trf.xlu0 }
  0xf1   : > { %575 = vmatmul.msk.f32.vlgmr.msra.gmra.mxu0 %vm276_vm0, %v260_v8 }
  0xf8   : > { %v261_v9 = vpop.trf.xlu0 }
  0xf9   : > { %576 = vmatmul.msk.f32.gmra.mxu0 %vm276_vm0, %v261_v9 }
 0x100   : > { %v262_v10 = vpop.trf.xlu0 }
 0x101   : > { %577 = vmatmul.msk.f32.gmra.mxu0 %vm276_vm0, %v262_v10 }
 0x108   : > { %v263_v11 = vpop.trf.xlu0 }
 0x109   : > { %578 = vmatmul.msk.f32.gmra.mxu0 %vm276_vm0, %v263_v11 }
 0x110   : > { %v264_v12 = vpop.trf.xlu0 }
 0x111   : > { %579 = vmatmul.msk.f32.vlgmr.msra.gmra.mxu1 %vm276_vm0, %v264_v12 }
 0x118   : > { %v265_v13 = vpop.trf.xlu0 }
 0x119   : > { %580 = vmatmul.msk.f32.gmra.mxu1 %vm276_vm0, %v265_v13 }
 0x120   : > { %v266_v14 = vpop.trf.xlu0 }
 0x121   : > { %581 = vmatmul.msk.f32.gmra.mxu1 %vm276_vm0, %v266_v14 }
 0x128   : > { %v267_v15 = vpop.trf.xlu0 }
 0x129   : > { %582 = vmatmul.msk.f32.gmra.mxu1 %vm276_vm0, %v267_v15 }
 0x130   : > { %v268_v16 = vpop.trf.xlu0 }
 0x131   : > { %583 = vmatmul.msk.f32.vlgmr.msra.gmra.mxu2 %vm276_vm0, %v268_v16 }
 0x138   : > { %v269_v17 = vpop.trf.xlu0 }
 0x139   : > { %584 = vmatmul.msk.f32.gmra.mxu2 %vm276_vm0, %v269_v17 }
 0x140   : > { %v270_v18 = vpop.trf.xlu0 }
 0x141   : > { %585 = vmatmul.msk.f32.gmra.mxu2 %vm276_vm0, %v270_v18 }
 0x148   : > { %v271_v19 = vpop.trf.xlu0 }
 0x149   : > { %586 = vmatmul.msk.f32.gmra.mxu2 %vm276_vm0, %v271_v19 }
 0x150   : > { %v272_v20 = vpop.trf.xlu0 }
 0x151   : > { %587 = vmatmul.msk.f32.vlgmr.msra.gmra.mxu3 %vm276_vm0, %v272_v20 }
 0x158   : > { %v273_v21 = vpop.trf.xlu0 }
 0x159   : > { %588 = vmatmul.msk.f32.gmra.mxu3 %vm276_vm0, %v273_v21 }
 0x160   : > { %v274_v22 = vpop.trf.xlu0 }
 0x161   : > { %589 = vmatmul.msk.f32.gmra.mxu3 %vm276_vm0, %v274_v22 }
 0x168   : > { %v275_v23 = vpop.trf.xlu0 }
 0x169   : > { %590 = vmatmul.msk.f32.gmra.mxu3 %vm276_vm0, %v275_v23 }
 0x16e   : > { %v342_v24 = vpop.f32.mrf.mxu0 }
 0x16f   : > { %v390_v25 = vmul.f32 0.03125, %v342_v24 }
 0x171   : > { %406 = vst [vmem:[%s1256_s12] sm:$0xff] %v390_v25 }
 0x176   : > { %v345_v26 = vpop.f32.mrf.mxu0 }
 0x177   : > { %v391_v27 = vmul.f32 0.03125, %v345_v26 }
 0x179   : > { %407 = vst [vmem:[%s1256_s12 + $0x8] sm:$0xff] %v391_v27 }
 0x17e   : > { %v348_v28 = vpop.f32.mrf.mxu0 }
 0x17f   : > { %v392_v29 = vmul.f32 0.03125, %v348_v28 }
 0x181   : > { %408 = vst [vmem:[%s1256_s12 + $0x10] sm:$0xff] %v392_v29 }
 0x186   : > { %v351_v30 = vpop.f32.mrf.mxu0 }
 0x187   : > { %v393_v31 = vmul.f32 0.03125, %v351_v30 }
 0x189   : > { %409 = vst [vmem:[%s1256_s12 + $0x18] sm:$0xff] %v393_v31 }
 0x18e   : > { %v354_v32 = vpop.f32.mrf.mxu1 }
 0x18f   : > { %v394_v33 = vmul.f32 0.03125, %v354_v32 }
 0x191   : > { %410 = vst [vmem:[%s1256_s12 + $0x20] sm:$0xff] %v394_v33 }
 0x196   : > { %v357_v34 = vpop.f32.mrf.mxu1 }
 0x197   : > { %v395_v35 = vmul.f32 0.03125, %v357_v34 }
 0x199   : > { %411 = vst [vmem:[%s1256_s12 + $0x28] sm:$0xff] %v395_v35 }
 0x19e   : > { %v360_v36 = vpop.f32.mrf.mxu1 }
 0x19f   : > { %v396_v37 = vmul.f32 0.03125, %v360_v36 }
 0x1a1   : > { %412 = vst [vmem:[%s1256_s12 + $0x30] sm:$0xff] %v396_v37 }
 0x1a6   : > { %v363_v38 = vpop.f32.mrf.mxu1 }
 0x1a7   : > { %v397_v39 = vmul.f32 0.03125, %v363_v38 }
 0x1a9   : > { %413 = vst [vmem:[%s1256_s12 + $0x38] sm:$0xff] %v397_v39 }
 0x1b4   : > { %v366_v40 = vpop.f32.mrf.mxu2 }
 0x1b5   : > { %v398_v41 = vmul.f32 0.03125, %v366_v40 }
 0x1b7   : > { %414 = vst [vmem:[%s1256_s12 + $0x40] sm:$0xff] %v398_v41 }
 0x1bc   : > { %v369_v42 = vpop.f32.mrf.mxu2 }
 0x1bd   : > { %v399_v43 = vmul.f32 0.03125, %v369_v42 }
 0x1bf   : > { %415 = vst [vmem:[%s1256_s12 + $0x48] sm:$0xff] %v399_v43 }
 0x1c4   : > { %v372_v44 = vpop.f32.mrf.mxu2 }
 0x1c5   : > { %v400_v45 = vmul.f32 0.03125, %v372_v44 }
 0x1c7   : > { %416 = vst [vmem:[%s1256_s12 + $0x50] sm:$0xff] %v400_v45 }
 0x1cc   : > { %v375_v46 = vpop.f32.mrf.mxu2 }
 0x1cd   : > { %v401_v47 = vmul.f32 0.03125, %v375_v46 }
 0x1cf   : > { %417 = vst [vmem:[%s1256_s12 + $0x58] sm:$0xff] %v401_v47 }
 0x1d4   : > { %v378_v48 = vpop.f32.mrf.mxu3 }
 0x1d5   : > { %v402_v49 = vmul.f32 0.03125, %v378_v48 }
 0x1d7   : > { %418 = vst [vmem:[%s1256_s12 + $0x60] sm:$0xff] %v402_v49 }
 0x1dc   : > { %v381_v50 = vpop.f32.mrf.mxu3 }
 0x1dd   : > { %v403_v51 = vmul.f32 0.03125, %v381_v50 }
 0x1df   : > { %419 = vst [vmem:[%s1256_s12 + $0x68] sm:$0xff] %v403_v51 }
 0x1e4   : > { %v384_v52 = vpop.f32.mrf.mxu3 }
 0x1e5   : > { %v404_v53 = vmul.f32 0.03125, %v384_v52 }
 0x1e7   : > { %420 = vst [vmem:[%s1256_s12 + $0x70] sm:$0xff] %v404_v53 }
 0x1ec   : > { %v387_v54 = vpop.f32.mrf.mxu3 }
 0x1ed   : > { %v405_v55 = vmul.f32 0.03125, %v387_v54 }
 0x1ef   : > { %421 = vst [vmem:[%s1256_s12 + $0x78] sm:$0xff] %v405_v55 }
 0x1f0   : > { %854 = shalt.err (!%p851_p3)
}
 0x1f1   : > { %s998_s3 = smov 128   ;;  %s999_s26 = smov 384  }
 0x1f2   : > { %s1000_s12 = smov 8  }
 0x1f3   : > { %617 = dma.vmem_to_hbm [thread:$0]  (%p1178_p1), %s440_s4, 2048, %s442_s2, %s423_s15, %s998_s3, %s999_s26, %s1000_s12  }
 0x1f4 PF: > { %s1411_s21 = sld [smem:[#allocation11_spill]]  ;;  %p631_p12 = scmp.ge.s32.totalorder %s993_s24, 2 }
 0x1f6   : > { %p627_p5 = pnand %p631_p12, %p1188_p13 }
 0x1f8   : > { %p628_p0 = pneg %p627_p5 }
 0x1fa   : > { %s456_s0 = sand.u32 1, %s1411_s21  }
 0x1fb   : > { %s457_s19 = scalar_lea.sflag [#allocation4], %s456_s0 }
 0x1fc   : > { %928 = dma.done.wait (%p628_p0), %s457_s19, 2048  }
 0x1fd   : > { %930 = vsyncadd (%p628_p0), %s457_s19, 4294965248  ;;  %s21_s24 = sadd.s32 1, %s993_s24   ;;  %s1414_s8 = sld [smem:[#allocation12_spill]] }
 0x1fe   : > { %p1298_p4 = scmp.ge.s32.totalorder %s21_s24, 20   ;;  %s1415_s23 = smov %s1210_s10 }
 0x1ff   : > { %s1416_s4 = smov %s1202_s9  ;;  %s1417_s2 = sld [smem:[#allocation16_spill]] }
 0x200   : > { %s1418_s19 = sld [smem:[#allocation17_spill]]  ;;  %s1425_s10 = smov %s941_s11 }
 0x201   : > { %s1419_s25 = sld [smem:[#allocation18_spill]]  ;;  %s1426_s11 = smov %s1415_s23 }
 0x202   : > { %s1420_s21 = sld [smem:[#allocation19_spill]]  ;;  %s1427_s12 = smov %s949_s13 }
 0x203   : > { %s1421_s22 = sld [smem:[#allocation20_spill]]  ;;  %s1423_s9 = smov %s1414_s8 }
 0x204   : > { %s1422_s5 = sld [smem:[#allocation22_spill]]  ;;  %s1428_s13 = smov %s953_s14 }
 0x205   : > { %s1429_s14 = smov %s1416_s4  ;;  %s1430_s15 = smov %s961_s16 }
 0x206   : > { %s1431_s16 = smov %s965_s17  ;;  %s1432_s17 = smov %s1197_s18 }
 0x207   : > { %s1433_s18 = smov %s1417_s2  ;;  %s1434_s20 = smov %s1419_s25 }
 0x208   :  { %20 = sbr.rel (!%p1298_p4) target bundleno = 16 (0x10), region = 86 }
 0x20a   : > { %s1435_s23 = smov %s1422_s5 }
 0x20d   :  { %463 = vsyncpa [#allocation3], 1 }
 0x20e   :  { %465 = vsyncpa [#allocation3 + $0x1], 1 }
 0x20f   :  { %466 = vsyncpa [#allocation6], 1 }
 0x210   :  { %468 = vsyncpa [#allocation6 + $0x1], 1 }
 0x211   :  { %469 = vsyncpa [#allocation4], 1 }
 0x212   :  { %471 = vsyncpa [#allocation4 + $0x1], 1 }

</bundles_post_ra>
